<compile_context>
chip_gen: v7x
topology: tpu7x:2x2x1
jax: 0.10.0
libtpu: 0.0.40
codegen_flags: <defaults>
</compile_context>

<pallas_src>
import jax
import jax.numpy as jnp
from jax.experimental import pallas as pl
from jax.experimental.pallas import tpu as pltpu

N_STEPS = 100
NUM_UNITS = 128
IN_DIM = 2
OUT_DIM = 2
DEFAULT_TILE_B = 1024


def _round_up(n, m):
    return ((n + m - 1) // m) * m


# ----------------------------------------------------------------------------
# Kernel
# ----------------------------------------------------------------------------
def mlp_diffusion_kernel(
    x_ref,      # [TB, 2]                  f32
    t_ref,      # [TB, 1]                  int32
    w1_ref,     # [2, 128]                 f32   (layer 0 runs on the VPU)
    emb0_ref,   # [EMB_ROWS, 128]          bf16  (emb0 + b1, zero-padded rows)
    w2a_ref,    # [128 + EMB_ROWS, 128]    bf16  ([W2 ; emb1 + b2])
    w3a_ref,    # [128 + EMB_ROWS, 128]    bf16  ([W3 ; emb2 + b3])
    w4_ref,     # [128, 2]                 bf16
    b4_ref,     # [1, 2]                   f32
    o_ref,      # [TB, 2]                  f32
):
    tb = x_ref.shape[0]
    emb_rows = emb0_ref.shape[0]

    # ---- one-hot(t), reused by layer 0's JIT gather and layers 1-2 K-augment --
    t_ids = t_ref[...]                                              # [TB, 1]
    iota = jax.lax.broadcasted_iota(jnp.int32, (tb, emb_rows), 1)   # [TB, R]
    onehot = (iota == t_ids).astype(jnp.bfloat16)                   # [TB, R]

    # ---- layer 0: Linear(2 -> 128) on the VPU (K=2 too small for MXU) --------
    # bias b1 is pre-folded into emb0_ref; e0 computed just-in-time.
    e0 = jnp.dot(onehot, emb0_ref[...],
                 preferred_element_type=jnp.float32)                # [TB, 128]
    x = x_ref[...]                                                  # [TB, 2]
    w1 = w1_ref[...]                                                # [2, 128]
    h = x[:, 0:1] * w1[0:1, :] + x[:, 1:2] * w1[1:2, :] + e0
    h = jnp.maximum(h, 0.0)

    # ---- layer 1: K-augmented Linear(128->128) + emb1 + b2 in one MXU pass ---
    lhs1 = jnp.concatenate([h.astype(jnp.bfloat16), onehot], axis=1)   # [TB, 256]
    h = jnp.dot(lhs1, w2a_ref[...], preferred_element_type=jnp.float32)
    h = jnp.maximum(h, 0.0)

    # ---- layer 2: K-augmented Linear(128->128) + emb2 + b3 --------------------
    lhs2 = jnp.concatenate([h.astype(jnp.bfloat16), onehot], axis=1)   # [TB, 256]
    h = jnp.dot(lhs2, w3a_ref[...], preferred_element_type=jnp.float32)
    h = jnp.maximum(h, 0.0)

    # ---- final: Linear(128 -> 2), b4 added in f32 ------------------------------
    out = jnp.dot(h.astype(jnp.bfloat16), w4_ref[...],
                  preferred_element_type=jnp.float32)
    o_ref[...] = (out + b4_ref[...]).astype(o_ref.dtype)


# ----------------------------------------------------------------------------
# Parameter preprocessing (one-time): fold biases, pad, K-augment, cast.
# ----------------------------------------------------------------------------
def prepare_kernel_params(params, n_steps=N_STEPS):
    emb_rows = _round_up(n_steps, 128)

    def fold_pad(emb, bias):
        e = emb + bias                       # fold per-layer bias into the table
        return jnp.pad(e, ((0, emb_rows - n_steps), (0, 0)))

    emb0t = fold_pad(params["emb0"], params["b1"]).astype(jnp.bfloat16)
    w2aug = jnp.concatenate(
        [params["w2"], fold_pad(params["emb1"], params["b2"])], axis=0
    ).astype(jnp.bfloat16)                   # [128 + emb_rows, 128]
    w3aug = jnp.concatenate(
        [params["w3"], fold_pad(params["emb2"], params["b3"])], axis=0
    ).astype(jnp.bfloat16)                   # [128 + emb_rows, 128]

    return dict(
        w1=params["w1"].astype(jnp.float32),     # VPU path stays f32
        emb0t=emb0t,
        w2aug=w2aug,
        w3aug=w3aug,
        w4=params["w4"].astype(jnp.bfloat16),
        b4=params["b4"].astype(jnp.float32),
    )


# ----------------------------------------------------------------------------
# Wrapper
# ----------------------------------------------------------------------------
def mlp_diffusion_forward(x_0, t, kparams, *, tile_b=DEFAULT_TILE_B):
    """x_0: [B, 2] float32, t: [B] int32, kparams: prepare_kernel_params(...)."""
    B = x_0.shape[0]
    TB = min(tile_b, _round_up(B, 8))
    padded_B = _round_up(B, TB)

    x_p = jnp.pad(x_0.astype(jnp.float32), ((0, padded_B - B), (0, 0)))
    t_p = jnp.pad(t.astype(jnp.int32), (0, padded_B - B))[:, None]   # [pB, 1]

    emb_rows = kparams["emb0t"].shape[0]
    k_aug = NUM_UNITS + emb_rows
    grid = (padded_B // TB,)

    flops = 2 * padded_B * (
        emb_rows * NUM_UNITS                # e0 JIT gather matmul
        + IN_DIM * NUM_UNITS                # layer 0 (VPU)
        + 2 * k_aug * NUM_UNITS             # K-augmented layers 1-2
        + NUM_UNITS * OUT_DIM               # final
    )
    weight_bytes = (
        kparams["w1"].size * 4 + kparams["b4"].size * 4
        + (kparams["emb0t"].size + kparams["w2aug"].size
           + kparams["w3aug"].size + kparams["w4"].size) * 2
    )
    bytes_accessed = padded_B * (IN_DIM * 4 + 4 + OUT_DIM * 4) + weight_bytes

    # VMEM budget: resident weights (x2 buffers) + double-buffered I/O tiles
    # + ~4 KiB/sample spill scratch + fixed headroom.  Clamped well under the
    # 64 MiB physical VMEM of v7x.
    io_tile_bytes = TB * (IN_DIM * 4 + 4 + OUT_DIM * 4)
    vmem_limit = int(min(48 << 20,
                         max(16 << 20,
                             (6 << 20) + 2 * weight_bytes
                             + 2 * io_tile_bytes + TB * 4096)))

    out_padded = pl.pallas_call(
        mlp_diffusion_kernel,
        out_shape=jax.ShapeDtypeStruct((padded_B, OUT_DIM), jnp.float32),
        grid=grid,
        in_specs=[
            pl.BlockSpec((TB, IN_DIM), lambda i: (i, 0)),             # x
            pl.BlockSpec((TB, 1), lambda i: (i, 0)),                  # t
            pl.BlockSpec((IN_DIM, NUM_UNITS), lambda i: (0, 0)),      # w1 (resident)
            pl.BlockSpec((emb_rows, NUM_UNITS), lambda i: (0, 0)),    # emb0 + b1
            pl.BlockSpec((k_aug, NUM_UNITS), lambda i: (0, 0)),       # [W2; emb1+b2]
            pl.BlockSpec((k_aug, NUM_UNITS), lambda i: (0, 0)),       # [W3; emb2+b3]
            pl.BlockSpec((NUM_UNITS, OUT_DIM), lambda i: (0, 0)),     # w4
            pl.BlockSpec((1, OUT_DIM), lambda i: (0, 0)),             # b4
        ],
        out_specs=pl.BlockSpec((TB, OUT_DIM), lambda i: (i, 0)),
        compiler_params=pltpu.CompilerParams(
            dimension_semantics=("parallel",),
            vmem_limit_bytes=vmem_limit,
        ),
        cost_estimate=pl.CostEstimate(
            flops=flops, transcendentals=0, bytes_accessed=bytes_accessed),
    )(x_p, t_p, kparams["w1"], kparams["emb0t"],
      kparams["w2aug"], kparams["w3aug"], kparams["w4"], kparams["b4"])

    return out_padded[:B]


# ----------------------------------------------------------------------------
# Init + reference
# ----------------------------------------------------------------------------
def init_params(key):
    """Deterministic init mimicking PyTorch nn.Linear / nn.Embedding shapes."""
    ks = jax.random.split(key, 11)

    def linear(kw, kb, fan_in, fan_out):
        bound = 1.0 / jnp.sqrt(float(fan_in))
        w = jax.random.uniform(kw, (fan_in, fan_out), jnp.float32, -bound, bound)
        b = jax.random.uniform(kb, (1, fan_out), jnp.float32, -bound, bound)
        return w, b

    w1, b1 = linear(ks[0], ks[1], IN_DIM, NUM_UNITS)
    w2, b2 = linear(ks[2], ks[3], NUM_UNITS, NUM_UNITS)
    w3, b3 = linear(ks[4], ks[5], NUM_UNITS, NUM_UNITS)
    w4, b4 = linear(ks[6], ks[7], NUM_UNITS, OUT_DIM)

    emb0 = jax.random.normal(ks[8], (N_STEPS, NUM_UNITS), jnp.float32)
    emb1 = jax.random.normal(ks[9], (N_STEPS, NUM_UNITS), jnp.float32)
    emb2 = jax.random.normal(ks[10], (N_STEPS, NUM_UNITS), jnp.float32)

    return dict(
        w1=w1, b1=b1, w2=w2, b2=b2, w3=w3, b3=b3, w4=w4, b4=b4,
        emb0=emb0, emb1=emb1, emb2=emb2,
    )


def reference_forward(x_0, t, params, *, bf16_matmul=False):
    """Pure-JAX reference of the PyTorch forward.

    bf16_matmul=True mimics the kernel's mixed precision (bf16 weights/tables on
    the MXU path, f32 accumulate/elementwise, b1-b3 folded+quantized to bf16).
    """
    def mb(a):
        return a.astype(jnp.bfloat16) if bf16_matmul else a

    prec = None if bf16_matmul else jax.lax.Precision.HIGHEST
    x = x_0.astype(jnp.float32)
    layers = [
        (params["w1"], params["b1"], params["emb0"]),
        (params["w2"], params["b2"], params["emb1"]),
        (params["w3"], params["b3"], params["emb2"]),
    ]
    for idx, (w, b, emb) in enumerate(layers):
        if idx == 0:
            lin = x[:, 0:1] * w[0:1, :] + x[:, 1:2] * w[1:2, :]
            add = mb(emb + b)[t].astype(jnp.float32) if bf16_matmul else emb[t] + b
        else:
            lin = jnp.dot(mb(x), mb(w), preferred_element_type=jnp.float32,
                          precision=prec)
            add = mb(emb + b)[t].astype(jnp.float32) if bf16_matmul else emb[t] + b
        x = jnp.maximum(lin + add, 0.0)
    out = jnp.dot(mb(x), mb(params["w4"]), preferred_element_type=jnp.float32,
                  precision=prec) + params["b4"]
    return out


if __name__ == "__main__":
    key = jax.random.PRNGKey(0)
    kp, kx, kt = jax.random.split(key, 3)

    params = init_params(kp)
    kparams = prepare_kernel_params(params)

    fwd = jax.jit(mlp_diffusion_forward, static_argnames=("tile_b",))

    # (B, tile_b): single tile, multi-tile with padding (B % TB != 0, grid=3),
    # and the default tile with grid=2 (exercises megacore sharding on v7x).
    cases = [(8, DEFAULT_TILE_B), (300, 128), (1500, DEFAULT_TILE_B)]
    for B, tile_b in cases:
        kx_i, kt_i = jax.random.split(jax.random.fold_in(kx, B), 2)
        x_0 = jax.random.normal(kx_i, (B, IN_DIM), jnp.float32)
        t = jax.random.randint(kt_i, (B,), 0, N_STEPS, jnp.int32)

        out = jax.block_until_ready(fwd(x_0, t, kparams, tile_b=tile_b))
        assert out.shape == (B, OUT_DIM)

        # Tight check vs. a reference matching the kernel's mixed precision.
        ref_bf16 = reference_forward(x_0, t, params, bf16_matmul=True)
        assert jnp.allclose(out, ref_bf16, atol=2e-3, rtol=1e-3), (B, tile_b)

        # Loose check vs. the pure-f32 PyTorch semantics (bf16 roundoff bound).
        ref_f32 = reference_forward(x_0, t, params, bf16_matmul=False)
        assert jnp.allclose(out, ref_f32, atol=1.5e-1, rtol=1e-1), (B, tile_b)

    print("KERNEL_OK")
</pallas_src>

<mosaic_0001>
module attributes {stable_mosaic.version = 11 : i64} {
  func.func @mlp_diffusion_kernel(%arg0: i32, %arg1: memref<8x2xf32, #tpu.memory_space<vmem>>, %arg2: memref<8x1xi32, #tpu.memory_space<vmem>>, %arg3: memref<2x128xf32, #tpu.memory_space<vmem>>, %arg4: memref<128x128xbf16, #tpu.memory_space<vmem>>, %arg5: memref<256x128xbf16, #tpu.memory_space<vmem>>, %arg6: memref<256x128xbf16, #tpu.memory_space<vmem>>, %arg7: memref<128x2xbf16, #tpu.memory_space<vmem>>, %arg8: memref<1x2xf32, #tpu.memory_space<vmem>>, %arg9: memref<8x2xf32, #tpu.memory_space<vmem>>) attributes {dimension_semantics = [#tpu.dimension_semantics<parallel>], iteration_bounds = array<i64: 1>, scalar_prefetch = 0 : i64, scratch_operands = 0 : i64, tpu.core_type = #tpu.core_type<tc>, window_params = [{transform_indices = @transform_0, window_bounds = array<i64: 8, 2>}, {transform_indices = @transform_1, window_bounds = array<i64: 8, 1>}, {pipeline_mode = #tpu.pipeline_mode<synchronous>, transform_indices = @transform_2, window_bounds = array<i64: 2, 128>}, {pipeline_mode = #tpu.pipeline_mode<synchronous>, transform_indices = @transform_3, window_bounds = array<i64: 128, 128>}, {pipeline_mode = #tpu.pipeline_mode<synchronous>, transform_indices = @transform_4, window_bounds = array<i64: 256, 128>}, {pipeline_mode = #tpu.pipeline_mode<synchronous>, transform_indices = @transform_5, window_bounds = array<i64: 256, 128>}, {pipeline_mode = #tpu.pipeline_mode<synchronous>, transform_indices = @transform_6, window_bounds = array<i64: 128, 2>}, {pipeline_mode = #tpu.pipeline_mode<synchronous>, transform_indices = @transform_7, window_bounds = array<i64: 1, 2>}, {transform_indices = @transform_8, window_bounds = array<i64: 8, 2>}]} {
    %c0 = arith.constant 0 : index
    %c0_0 = arith.constant 0 : index
    %0 = vector.load %arg2[%c0, %c0_0] : memref<8x1xi32, #tpu.memory_space<vmem>>, vector<8x1xi32>
    %1 = tpu.iota {dimensions = array<i32: 1>} : vector<8x128xi32>
    %2 = vector.broadcast %0 : vector<8x1xi32> to vector<8x128xi32>
    %3 = arith.cmpi eq, %1, %2 : vector<8x128xi32>
    %4 = arith.extui %3 : vector<8x128xi1> to vector<8x128xi32>
    %5 = arith.sitofp %4 : vector<8x128xi32> to vector<8x128xf32>
    %6 = arith.truncf %5 : vector<8x128xf32> to vector<8x128xbf16>
    %c0_1 = arith.constant 0 : index
    %c0_2 = arith.constant 0 : index
    %7 = vector.load %arg4[%c0_1, %c0_2] : memref<128x128xbf16, #tpu.memory_space<vmem>>, vector<128x128xbf16>
    %cst = arith.constant dense<0.000000e+00> : vector<8x128xf32>
    %8 = tpu.matmul %6, %7, %cst {dimension_numbers = #tpu.dot_dimension_numbers<[1], [0], [0], [1], [0, 0, 1, 1], [], []>} : vector<8x128xbf16>, vector<128x128xbf16>, vector<8x128xf32> -> vector<8x128xf32>
    %c0_3 = arith.constant 0 : index
    %c0_4 = arith.constant 0 : index
    %9 = vector.load %arg1[%c0_3, %c0_4] : memref<8x2xf32, #tpu.memory_space<vmem>>, vector<8x2xf32>
    %c0_5 = arith.constant 0 : index
    %c0_6 = arith.constant 0 : index
    %10 = vector.load %arg3[%c0_5, %c0_6] : memref<2x128xf32, #tpu.memory_space<vmem>>, vector<2x128xf32>
    %11 = vector.extract_strided_slice %9 {offsets = [0, 0], sizes = [8, 1], strides = [1, 1]} : vector<8x2xf32> to vector<8x1xf32>
    %12 = vector.extract_strided_slice %10 {offsets = [0, 0], sizes = [1, 128], strides = [1, 1]} : vector<2x128xf32> to vector<1x128xf32>
    %13 = vector.broadcast %11 : vector<8x1xf32> to vector<8x128xf32>
    %14 = vector.broadcast %12 : vector<1x128xf32> to vector<8x128xf32>
    %15 = arith.mulf %13, %14 : vector<8x128xf32>
    %16 = vector.extract_strided_slice %9 {offsets = [0, 1], sizes = [8, 1], strides = [1, 1]} : vector<8x2xf32> to vector<8x1xf32>
    %17 = vector.extract_strided_slice %10 {offsets = [1, 0], sizes = [1, 128], strides = [1, 1]} : vector<2x128xf32> to vector<1x128xf32>
    %18 = vector.broadcast %16 : vector<8x1xf32> to vector<8x128xf32>
    %19 = vector.broadcast %17 : vector<1x128xf32> to vector<8x128xf32>
    %20 = arith.mulf %18, %19 : vector<8x128xf32>
    %21 = arith.addf %15, %20 : vector<8x128xf32>
    %22 = arith.addf %21, %8 : vector<8x128xf32>
    %cst_7 = arith.constant 0.000000e+00 : f32
    %23 = vector.broadcast %cst_7 : f32 to vector<8x128xf32>
    %24 = arith.maximumf %22, %23 : vector<8x128xf32>
    %25 = arith.truncf %24 : vector<8x128xf32> to vector<8x128xbf16>
    %26 = tpu.concatenate %25, %6 in 1 : vector<8x128xbf16>, vector<8x128xbf16> -> vector<8x256xbf16>
    %c0_8 = arith.constant 0 : index
    %c0_9 = arith.constant 0 : index
    %27 = vector.load %arg5[%c0_8, %c0_9] : memref<256x128xbf16, #tpu.memory_space<vmem>>, vector<256x128xbf16>
    %cst_10 = arith.constant dense<0.000000e+00> : vector<8x128xf32>
    %28 = tpu.matmul %26, %27, %cst_10 {dimension_numbers = #tpu.dot_dimension_numbers<[1], [0], [0], [1], [0, 0, 1, 1], [], []>} : vector<8x256xbf16>, vector<256x128xbf16>, vector<8x128xf32> -> vector<8x128xf32>
    %cst_11 = arith.constant 0.000000e+00 : f32
    %29 = vector.broadcast %cst_11 : f32 to vector<8x128xf32>
    %30 = arith.maximumf %28, %29 : vector<8x128xf32>
    %31 = arith.truncf %30 : vector<8x128xf32> to vector<8x128xbf16>
    %32 = tpu.concatenate %31, %6 in 1 : vector<8x128xbf16>, vector<8x128xbf16> -> vector<8x256xbf16>
    %c0_12 = arith.constant 0 : index
    %c0_13 = arith.constant 0 : index
    %33 = vector.load %arg6[%c0_12, %c0_13] : memref<256x128xbf16, #tpu.memory_space<vmem>>, vector<256x128xbf16>
    %cst_14 = arith.constant dense<0.000000e+00> : vector<8x128xf32>
    %34 = tpu.matmul %32, %33, %cst_14 {dimension_numbers = #tpu.dot_dimension_numbers<[1], [0], [0], [1], [0, 0, 1, 1], [], []>} : vector<8x256xbf16>, vector<256x128xbf16>, vector<8x128xf32> -> vector<8x128xf32>
    %cst_15 = arith.constant 0.000000e+00 : f32
    %35 = vector.broadcast %cst_15 : f32 to vector<8x128xf32>
    %36 = arith.maximumf %34, %35 : vector<8x128xf32>
    %37 = arith.truncf %36 : vector<8x128xf32> to vector<8x128xbf16>
    %c0_16 = arith.constant 0 : index
    %c0_17 = arith.constant 0 : index
    %38 = vector.load %arg7[%c0_16, %c0_17] : memref<128x2xbf16, #tpu.memory_space<vmem>>, vector<128x2xbf16>
    %cst_18 = arith.constant dense<0.000000e+00> : vector<8x2xf32>
    %39 = tpu.matmul %37, %38, %cst_18 {dimension_numbers = #tpu.dot_dimension_numbers<[1], [0], [0], [1], [0, 0, 1, 1], [], []>} : vector<8x128xbf16>, vector<128x2xbf16>, vector<8x2xf32> -> vector<8x2xf32>
    %c0_19 = arith.constant 0 : index
    %c0_20 = arith.constant 0 : index
    %40 = vector.load %arg8[%c0_19, %c0_20] : memref<1x2xf32, #tpu.memory_space<vmem>>, vector<1x2xf32>
    %41 = vector.broadcast %40 : vector<1x2xf32> to vector<8x2xf32>
    %42 = arith.addf %39, %41 : vector<8x2xf32>
    %c0_21 = arith.constant 0 : index
    %c0_22 = arith.constant 0 : index
    %43 = vector.load %arg9[%c0_21, %c0_22] : memref<8x2xf32, #tpu.memory_space<vmem>>, vector<8x2xf32>
    tpu.vector_store %arg9[%c0_21, %c0_22], %42 {strides = array<i32>} : memref<8x2xf32, #tpu.memory_space<vmem>>, vector<8x2xf32>,
    return
  }
  func.func @transform_0(%arg0: i32) -> (i32, i32) {
    %c0_i32 = arith.constant 0 : i32
    %c0_i32_0 = arith.constant 0 : i32
    return %arg0, %c0_i32 : i32, i32
  }
  func.func @transform_1(%arg0: i32) -> (i32, i32) {
    %c0_i32 = arith.constant 0 : i32
    %c0_i32_0 = arith.constant 0 : i32
    return %arg0, %c0_i32 : i32, i32
  }
  func.func @transform_2(%arg0: i32) -> (i32, i32) {
    %c0_i32 = arith.constant 0 : i32
    %c0_i32_0 = arith.constant 0 : i32
    %c0_i32_1 = arith.constant 0 : i32
    return %c0_i32, %c0_i32_0 : i32, i32
  }
  func.func @transform_3(%arg0: i32) -> (i32, i32) {
    %c0_i32 = arith.constant 0 : i32
    %c0_i32_0 = arith.constant 0 : i32
    %c0_i32_1 = arith.constant 0 : i32
    return %c0_i32, %c0_i32_0 : i32, i32
  }
  func.func @transform_4(%arg0: i32) -> (i32, i32) {
    %c0_i32 = arith.constant 0 : i32
    %c0_i32_0 = arith.constant 0 : i32
    %c0_i32_1 = arith.constant 0 : i32
    return %c0_i32, %c0_i32_0 : i32, i32
  }
  func.func @transform_5(%arg0: i32) -> (i32, i32) {
    %c0_i32 = arith.constant 0 : i32
    %c0_i32_0 = arith.constant 0 : i32
    %c0_i32_1 = arith.constant 0 : i32
    return %c0_i32, %c0_i32_0 : i32, i32
  }
  func.func @transform_6(%arg0: i32) -> (i32, i32) {
    %c0_i32 = arith.constant 0 : i32
    %c0_i32_0 = arith.constant 0 : i32
    %c0_i32_1 = arith.constant 0 : i32
    return %c0_i32, %c0_i32_0 : i32, i32
  }
  func.func @transform_7(%arg0: i32) -> (i32, i32) {
    %c0_i32 = arith.constant 0 : i32
    %c0_i32_0 = arith.constant 0 : i32
    %c0_i32_1 = arith.constant 0 : i32
    return %c0_i32, %c0_i32_0 : i32, i32
  }
  func.func @transform_8(%arg0: i32) -> (i32, i32) {
    %c0_i32 = arith.constant 0 : i32
    %c0_i32_0 = arith.constant 0 : i32
    return %arg0, %c0_i32 : i32, i32
  }
}

</mosaic_0001>

<bundles_post_ra>
// kernel: mlp_diffusion_forward.1
= control target key start
LH: loop header
LB: loop body
LE: loop exit
PB: predicated region body
PF: predicated region fallthrough
CT: control target
= control target key end

     0   :  { %13 = vsyncpa [#allocation3], 0  ;;  %s1083_s0 = inlined_call_operand.vmem [shape: f32[8,2], index: 0, kind: input, shape index: {}]   ;;  %s1084_s1 = inlined_call_operand.vmem [shape: s32[8,1], index: 1, kind: input, shape index: {}]   ;;  %s1085_s2 = inlined_call_operand.vmem [shape: f32[2,128], index: 2, kind: input, shape index: {}]   ;;  %s1086_s3 = inlined_call_operand.vmem [shape: bf16[128,128], index: 3, kind: input, shape index: {}]   ;;  %s1087_s4 = inlined_call_operand.hbm [shape: bf16[256,128], index: 4, kind: input, shape index: {}]   ;;  %s1088_s5 = inlined_call_operand.hbm [shape: bf16[256,128], index: 5, kind: input, shape index: {}]   ;;  %s1089_s6 = inlined_call_operand.vmem [shape: bf16[128,2], index: 6, kind: input, shape index: {}]   ;;  %s1090_s7 = inlined_call_operand.vmem [shape: f32[1,2], index: 7, kind: input, shape index: {}]   ;;  %s1091_s8 = inlined_call_operand.vmem [shape: f32[8,2], index: 8, kind: output, shape index: {}]  }
   0x1   :  { %14 = vsyncpa [#allocation5], 0  ;;  %s922_s27 = smov [#allocation2]   ;;  %s874_s9 = scalar_lea.hbm %s1087_s4, 2048 }
   0x2   :  { %s28_s28 = sshll.u32 %s922_s27, 4  ;;  %p875_p0 = scmp.ne.s32.totalorder %s1087_s4, %s874_s9  ;;  %s29_s28 = int_to_ptr.vmem [resolvable:$true] %s28_s28 }
   0x3   :  { %p878_p1 = scmp.lt.u32.totalorder %s874_s9, %s1087_s4 }
   0x5   :  { %p880_p2 = pnand %p878_p1, %p875_p0 }
   0x7   :  { %883 = shalt.err (!%p880_p2)
}
   0x8   :  { %s884_s14 = scalar_lea.vmem %s29_s28, 2048  ;;  %p889_p4 = scmp.lt.s32.totalorder %s29_s28, %s29_s28 }
   0x9   :  { %p885_p3 = scmp.ne.s32.totalorder %s29_s28, %s884_s14  ;;  %p890_p5 = scmp.lt.s32.totalorder %s884_s14, %s884_s14 }
   0xb   :  { %p891_p6 = por %p890_p5, %p889_p4 }
   0xd   :  { %p892_p7 = pnand %p891_p6, %p885_p3 }
   0xf   :  { %895 = shalt.err (!%p892_p7)
}
  0x10   :  { %s923_s15 = smov 64   ;;  %s924_s16 = smov 4  }
  0x11   :  { %34 = dma.hbm_to_vmem [thread:$0]  %s1087_s4, 2048, %s29_s28, [#allocation3], %s923_s15, %s923_s15, %s924_s16  }
  0x12   :  { %s925_s19 = smov [#allocation4]   ;;  %s896_s23 = scalar_lea.hbm %s1088_s5, 2048 }
  0x13   :  { %s40_s20 = sshll.u32 %s925_s19, 4  ;;  %p897_p8 = scmp.ne.s32.totalorder %s1088_s5, %s896_s23  ;;  %s41_s20 = int_to_ptr.vmem [resolvable:$true] %s40_s20 }
  0x14   :  { %p900_p9 = scmp.lt.u32.totalorder %s896_s23, %s1088_s5 }
  0x16   :  { %p902_p10 = pnand %p900_p9, %p897_p8 }
  0x18   :  { %905 = shalt.err (!%p902_p10)
}
  0x19   :  { %s906_s29 = scalar_lea.vmem %s41_s20, 2048  ;;  %p911_p12 = scmp.lt.s32.totalorder %s41_s20, %s41_s20 }
  0x1a   :  { %p907_p11 = scmp.ne.s32.totalorder %s41_s20, %s906_s29  ;;  %p912_p13 = scmp.lt.s32.totalorder %s906_s29, %s906_s29 }
  0x1c   :  { %p913_p0 = por %p912_p13, %p911_p12 }
  0x1e   :  { %p914_p1 = pnand %p913_p0, %p907_p11 }
  0x20   :  { %917 = shalt.err (!%p914_p1)
}
  0x21   :  { %46 = dma.hbm_to_vmem [thread:$0]  %s1088_s5, 2048, %s41_s20, [#allocation5], %s923_s15, %s923_s15, %s924_s16  }
  0x22   :  { %918 = dma.done.wait [#allocation3], 2048  }
  0x23   :  { %919 = vsyncadd [#allocation3], 4294965248 }
  0x24   :  { %920 = dma.done.wait [#allocation5], 2048  }
  0x25   :  { %921 = vsyncadd [#allocation5], 4294965248  ;;  %v926_v0 = vmov 0   ;;  %v927_v1 = vmov 1   ;;  %v928_v2 = vmov 0.0   ;;  %v58_v3 = vld [vmem:[%s1084_s1] sm:$0xff]  ;;  %v59_v26 = vlaneseq }
  0x26   :  { %823 = vset.pattern.permute.xlu0 %v926_v0  ;;  %824 = vset.pattern.permute.xlu1 %v927_v1  ;;  %v172_v4 = vld [vmem:[%s1083_s0] sm:$0xff]  ;;  %vm929_vm0 = vmmov 0   ;;  %v827_v6 = vld [vmem:[%s1086_s3 + $0x8] sm:$0xff]   ;;  %v828_v7 = vld [vmem:[%s1086_s3 + $0x10] sm:$0xff]   ;;  %v930_v29 = vmov 1.0|1.0  }
  0x27   :  { %774 = vmatprep.subr.bf16.mxu0 %v928_v2  ;;  %62 = vperm.xlu0 %823, %v58_v3   ;;  %v826_v5 = vld [vmem:[%s1086_s3] sm:$0xff]   ;;  %v829_v9 = vld [vmem:[%s1086_s3 + $0x18] sm:$0xff]   ;;  %v836_v11 = vld [vmem:[#allocation2 + $0x48] sm:$0xff]   ;;  %v60_v27 = vand.u32 127, %v59_v26  ;;  %v180_v45 = vshrl.u32 %v59_v26, 7  ;;  %vm648_vm3 = vcmask 15360  }
  0x28   :  { %185 = vperm.xlu1 %824, %v172_v4   ;;  %790 = vmatprep.mubr.msk.bf16.mxu0 %vm929_vm0, %v928_v2  ;;  %v834_v8 = vld [vmem:[#allocation2 + $0x40] sm:$0xff]   ;;  %v837_v12 = vld [vmem:[#allocation2 + $0x8] sm:$0xff]   ;;  %v838_v13 = vld [vmem:[#allocation2 + $0x50] sm:$0xff]  }
  0x29   :  { %775 = vmatpush3.bf16.msra.mxu0 %v826_v5  ;;  %721 = vmatprep.subr.bf16.mxu1 %v834_v8  ;;  %v835_v10 = vld [vmem:[#allocation2] sm:$0xff]   ;;  %v839_v15 = vld [vmem:[#allocation2 + $0x10] sm:$0xff]   ;;  %v840_v16 = vld [vmem:[#allocation2 + $0x58] sm:$0xff]   ;;  %v190_v46 = vsub.s32 1, %v180_v45  ;;  %v181_v47 = vsub.s32 0, %v180_v45 }
  0x2a   :  { %776 = vmatprep.subr.bf16.mxu0 %v928_v2  ;;  %722 = vmatpush3.bf16.msra.mxu1 %v835_v10  ;;  %v830_v14 = vld [vmem:[%s1086_s3 + $0x20] sm:$0xff]   ;;  %v831_v17 = vld [vmem:[%s1086_s3 + $0x28] sm:$0xff]   ;;  %v841_v18 = vld [vmem:[#allocation2 + $0x18] sm:$0xff]  }
  0x2b   :  { %176 = vperm.xlu0 %823, %v172_v4   ;;  %723 = vmatprep.subr.bf16.mxu1 %v836_v11  ;;  %v832_v19 = vld [vmem:[%s1086_s3 + $0x30] sm:$0xff]   ;;  %v842_v20 = vld [vmem:[#allocation2 + $0x60] sm:$0xff]   ;;  %v844_v22 = vld [vmem:[#allocation2 + $0x68] sm:$0xff]  }
  0x2c   :  { %v843_v21 = vld [vmem:[#allocation2 + $0x20] sm:$0xff]   ;;  %v833_v23 = vld [vmem:[%s1086_s3 + $0x38] sm:$0xff]   ;;  %v845_v24 = vld [vmem:[#allocation2 + $0x28] sm:$0xff]  }
  0x2d   :  { %777 = vmatpush3.bf16.msra.mxu0 %v827_v6  ;;  %v846_v25 = vld [vmem:[#allocation2 + $0x70] sm:$0xff]   ;;  %v848_v31 = vld [vmem:[#allocation2 + $0x78] sm:$0xff]   ;;  %v850_v33 = vld [vmem:[#allocation4 + $0x40] sm:$0xff]  }
  0x2e   :  { %778 = vmatprep.subr.bf16.mxu0 %v928_v2  ;;  %724 = vmatpush3.bf16.msra.mxu1 %v837_v12  ;;  %v847_v30 = vld [vmem:[#allocation2 + $0x30] sm:$0xff]   ;;  %v849_v32 = vld [vmem:[#allocation2 + $0x38] sm:$0xff]   ;;  %v851_v34 = vld [vmem:[#allocation4] sm:$0xff]  }
  0x2f   :  { %825 = vset.pattern.permute.xlu0 %v927_v1  ;;  %725 = vmatprep.subr.bf16.mxu1 %v838_v13  ;;  %v852_v35 = vld [vmem:[#allocation4 + $0x48] sm:$0xff]   ;;  %v854_v37 = vld [vmem:[#allocation4 + $0x50] sm:$0xff]   ;;  %v856_v39 = vld [vmem:[#allocation4 + $0x58] sm:$0xff]  }
  0x30   :  { %v853_v36 = vld [vmem:[#allocation4 + $0x8] sm:$0xff]   ;;  %v855_v38 = vld [vmem:[#allocation4 + $0x10] sm:$0xff]   ;;  %v857_v40 = vld [vmem:[#allocation4 + $0x18] sm:$0xff]  }
  0x31   :  { %779 = vmatpush3.bf16.msra.mxu0 %v828_v7  ;;  %v858_v41 = vld [vmem:[#allocation4 + $0x60] sm:$0xff]   ;;  %v860_v43 = vld [vmem:[#allocation4 + $0x68] sm:$0xff]   ;;  %v862_v63 = vld [vmem:[#allocation4 + $0x70] sm:$0xff]  }
  0x32   :  { %780 = vmatprep.subr.bf16.mxu0 %v928_v2  ;;  %726 = vmatpush3.bf16.msra.mxu1 %v839_v15  ;;  %v859_v42 = vld [vmem:[#allocation4 + $0x20] sm:$0xff]   ;;  %v861_v44 = vld [vmem:[#allocation4 + $0x28] sm:$0xff]   ;;  %v863_v0 = vld [vmem:[#allocation4 + $0x30] sm:$0xff]  }
  0x33   :  { %727 = vmatprep.subr.bf16.mxu1 %v840_v16  ;;  %v173_v48 = vld [vmem:[%s1085_s2] sm:$0x3]  ;;  %v864_v1 = vld [vmem:[#allocation4 + $0x78] sm:$0xff]   ;;  %v867_v5 = vld [vmem:[%s1089_s6 + $0x8] sm:$0xff]  }
  0x34   :  { %v191_v49 = vrot.slane %v173_v48, %v190_v46  ;;  %v182_v50 = vrot.slane %v173_v48, %v181_v47  ;;  %v865_v3 = vld [vmem:[#allocation4 + $0x38] sm:$0xff]   ;;  %v866_v4 = vld [vmem:[%s1089_s6] sm:$0xff]   ;;  %v868_v6 = vld [vmem:[%s1089_s6 + $0x10] sm:$0xff]  }
  0x35   :  { %781 = vmatpush3.bf16.msra.mxu0 %v829_v9  ;;  %v869_v7 = vld [vmem:[%s1089_s6 + $0x18] sm:$0xff]   ;;  %v870_v8 = vld [vmem:[%s1089_s6 + $0x20] sm:$0xff]   ;;  %v871_v9 = vld [vmem:[%s1089_s6 + $0x28] sm:$0xff]  }
  0x36   :  { %782 = vmatprep.subr.bf16.mxu0 %v928_v2  ;;  %728 = vmatpush3.bf16.msra.mxu1 %v841_v18  ;;  %v873_v18 = vld [vmem:[%s1089_s6 + $0x38] sm:$0xff]   ;;  %v703_v26 = vld [vmem:[%s1090_s7] ss:$0 sm:$0xff] }
  0x37   :  { %729 = vmatprep.subr.bf16.mxu1 %v842_v20 }
  0x39   :  { %783 = vmatpush3.bf16.msra.mxu0 %v830_v14 }
  0x3a   :  { %784 = vmatprep.subr.bf16.mxu0 %v928_v2  ;;  %730 = vmatpush3.bf16.msra.mxu1 %v843_v21 }
  0x3b   :  { %731 = vmatprep.subr.bf16.mxu1 %v844_v22 }
  0x3d   :  { %785 = vmatpush3.bf16.msra.mxu0 %v831_v17  ;;  %v872_v17 = vld [vmem:[%s1089_s6 + $0x30] sm:$0xff]  }
  0x3e   :  { %786 = vmatprep.subr.bf16.mxu0 %v928_v2  ;;  %732 = vmatpush3.bf16.msra.mxu1 %v845_v24 }
  0x3f   :  { %733 = vmatprep.subr.bf16.mxu1 %v846_v25 }
  0x41   :  { %787 = vmatpush3.bf16.msra.mxu0 %v832_v19 }
  0x42   :  { %788 = vmatprep.subr.bf16.mxu0 %v928_v2  ;;  %734 = vmatpush3.bf16.msra.mxu1 %v847_v30 }
  0x43   :  { %735 = vmatprep.subr.bf16.mxu1 %v848_v31 }
  0x45   :  { %789 = vmatpush3.bf16.msra.mxu0 %v833_v23 }
  0x46   :  { %736 = vmatpush3.bf16.msra.mxu1 %v849_v32  ;;  %743 = vmatprep.subr.bf16.mxu0 %v850_v33 }
  0x47   :  { %794 = vmatprep.subr.bf16.mxu1 %v928_v2 }
  0xa6   :  { %v63_v28 = vpop.permute.xlu0 %62 }
  0xa7   :  { %vm64_vm1 = vcmp.eq.s32.totalorder %v60_v27, %v63_v28  ;;  %v186_v51 = vpop.permute.xlu1 %185 }
  0xa8   :  { %vm665_vm2 = vmpackc.low %vm64_vm1, %vm64_vm1  ;;  %v192_v53 = vmul.f32 %v191_v49, %v186_v51 }
  0xa9   :  { %791 = vmatmul.mubr.msk.bf16.vlgmr.msra.gmra.mrb[0].mxu0 %vm665_vm2, %v930_v29  ;;  %684 = vmatprep.mubr.msk.bf16.mxu1 %vm665_vm2, %v930_v29 }
  0xaa   :  { %702 = vmatprep.mubr.msk.bf16.mxu0 %vm665_vm2, %v930_v29  ;;  %744 = vmatpush3.bf16.msra.mxu0 %v851_v34  ;;  %v177_v52 = vpop.permute.xlu0 %176 }
  0xab   :  { %745 = vmatprep.subr.bf16.mxu0 %v852_v35  ;;  %v183_v54 = vmul.f32 %v182_v50, %v177_v52 }
  0xad   :  { %v193_v55 = vadd.f32 %v192_v53, %v183_v54 }
  0xae   :  { %746 = vmatpush3.bf16.msra.mxu0 %v853_v36 }
  0xaf   :  { %747 = vmatprep.subr.bf16.mxu0 %v854_v37 }
  0xb2   :  { %748 = vmatpush3.bf16.msra.mxu0 %v855_v38 }
  0xb3   :  { %749 = vmatprep.subr.bf16.mxu0 %v856_v39 }
  0xb6   :  { %750 = vmatpush3.bf16.msra.mxu0 %v857_v40 }
  0xb7   :  { %751 = vmatprep.subr.bf16.mxu0 %v858_v41 }
  0xba   :  { %752 = vmatpush3.bf16.msra.mxu0 %v859_v42 }
  0xbb   :  { %753 = vmatprep.subr.bf16.mxu0 %v860_v43 }
  0xbe   :  { %754 = vmatpush3.bf16.msra.mxu0 %v861_v44 }
  0xbf   :  { %755 = vmatprep.subr.bf16.mxu0 %v862_v63 }
  0xc2   :  { %756 = vmatpush3.bf16.msra.mxu0 %v863_v0 }
  0xc3   :  { %757 = vmatprep.subr.bf16.mxu0 %v864_v1 }
  0xc6   :  { %758 = vmatpush3.bf16.msra.mxu0 %v865_v3 }
 0x17c   :  { %v166_v56 = vpop.f32.mrb[0].mxu0 }
 0x17d   :  { %v194_v57 = vadd.f32 %v193_v55, %v166_v56  ;;  %v792_v58 = vpop.f32.mrb[1].mxu0 }
 0x17e   :  { %v169_v59 = vpop.f32.mrb[2].mxu0 }
 0x17f   :  { %v195_v60 = vmax.f32 %v194_v57, 0.0  ;;  %v793_v61 = vpop.f32.mrb[3].mxu0 }
 0x181   :  { %v196_v62 = vpack.c.bf16 %v195_v60, %v195_v60 }
 0x183   :  { %358 = vmatmul.mubr.bf16.vlgmr.msra.gmra.mrb[0].mxu1 %v196_v62 }
 0x184   :  { %810 = vmatprep.mubr.msk.bf16.mxu1 %vm929_vm0, %v928_v2  ;;  %795 = vmatpush3.bf16.msra.mxu1 %v866_v4 }
 0x185   :  { %796 = vmatprep.subr.bf16.mxu1 %v928_v2 }
 0x188   :  { %797 = vmatpush3.bf16.msra.mxu1 %v867_v5 }
 0x189   :  { %798 = vmatprep.subr.bf16.mxu1 %v928_v2 }
 0x18c   :  { %799 = vmatpush3.bf16.msra.mxu1 %v868_v6 }
 0x18d   :  { %800 = vmatprep.subr.bf16.mxu1 %v928_v2 }
 0x190   :  { %801 = vmatpush3.bf16.msra.mxu1 %v869_v7 }
 0x191   :  { %802 = vmatprep.subr.bf16.mxu1 %v928_v2 }
 0x194   :  { %803 = vmatpush3.bf16.msra.mxu1 %v870_v8 }
 0x195   :  { %804 = vmatprep.subr.bf16.mxu1 %v928_v2 }
 0x198   :  { %805 = vmatpush3.bf16.msra.mxu1 %v871_v9 }
 0x199   :  { %806 = vmatprep.subr.bf16.mxu1 %v928_v2 }
 0x19c   :  { %807 = vmatpush3.bf16.msra.mxu1 %v872_v17 }
 0x19d   :  { %808 = vmatprep.subr.bf16.mxu1 %v928_v2 }
 0x1a0   :  { %809 = vmatpush3.bf16.msra.mxu1 %v873_v18 }
 0x256   :  { %v737_v10 = vpop.f32.mrb[0].mxu1 }
 0x257   :  { %v738_v11 = vpop.f32.mrb[1].mxu1 }
 0x258   :  { %v739_v12 = vadd.f32 %v738_v11, %v737_v10  ;;  %v740_v13 = vpop.f32.mrb[2].mxu1 }
 0x259   :  { %v741_v14 = vpop.f32.mrb[3].mxu1 }
 0x25a   :  { %v365_v15 = vmax.f32 %v739_v12, 0.0 }
 0x25c   :  { %v366_v16 = vpack.c.bf16 %v365_v15, %v365_v15 }
 0x25e   :  { %528 = vmatmul.mubr.bf16.vlgmr.msra.gmra.mrb[4].mxu0 %v366_v16 }
 0x331   :  { %v759_v19 = vpop.f32.mrb[4].mxu0 }
 0x332   :  { %v760_v20 = vpop.f32.mrb[5].mxu0 }
 0x333   :  { %v761_v21 = vadd.f32 %v760_v20, %v759_v19  ;;  %v762_v22 = vpop.f32.mrb[6].mxu0 }
 0x334   :  { %v763_v23 = vpop.f32.mrb[7].mxu0 }
 0x335   :  { %v535_v24 = vmax.f32 %v761_v21, 0.0 }
 0x337   :  { %v536_v25 = vpack.c.bf16 %v535_v24, %v535_v24 }
 0x339   :  { %811 = vmatmul.mubr.bf16.vlgmr.msra.gmra.mrb[4].mxu1 %v536_v25 }
 0x40c   :  { %v642_v27 = vpop.f32.mrb[4].mxu1 }
 0x40d   :  { %v643_v2 = vadd.f32 %v703_v26, %v642_v27  ;;  %v812_v28 = vpop.f32.mrb[5].mxu1 }
 0x40e   :  { %v645_v29 = vpop.f32.mrb[6].mxu1 }
 0x40f   :  { %649 = vst.msk [vmem:[%s1091_s8] sm:$0xff] %vm648_vm3, %v643_v2  ;;  %v813_v30 = vpop.f32.mrb[7].mxu1 }
 0x410   :  { %654 = vsyncpa [#allocation3], 1 }
 0x411   :  { %655 = vsyncpa [#allocation5], 1 }

</bundles_post_ra>
